<compile_context>
chip_gen: v5e
topology: v5e:2x2
jax: 0.10.0
libtpu: 0.0.40
codegen_flags: <defaults>
</compile_context>

<pallas_src>
import jax
import jax.numpy as jnp
from jax import lax
from jax.experimental import pallas as pl
from jax.experimental.pallas import tpu as pltpu


def _round_up(n, m):
    return ((n + m - 1) // m) * m


def _choose_batch_tile(rows, cols, *, target_tile_bytes, vmem_budget_bytes=12 << 20):
    """Pick a batch-tile size (multiple of 8, or the full batch)."""
    bytes_per_row = cols * 4
    # ~target_tile_bytes of x per grid step.
    tb = max(8, (target_tile_bytes // bytes_per_row) // 8 * 8)
    # Keep the double-buffered x stream comfortably inside VMEM on every gen
    # (v5e's default scoped limit is only 16 MiB).
    max_rows_vmem = max(8, (vmem_budget_bytes // (2 * bytes_per_row)) // 8 * 8)
    tb = min(tb, max_rows_vmem)
    # Keep >=4 grid steps when the batch is large enough (pipelining; lets
    # dimension_semantics=('parallel',) actually shard across v7x's 2 TCs).
    if rows >= 4 * 8:
        tb = min(tb, _round_up(pl.cdiv(rows, 4), 8))
    if tb >= rows:
        tb = rows  # single full-extent block (exempt from the multiple-of-8 rule)
    return tb


def _linear_kernel(x_ref, w_ref, b_ref, o_ref):
    # x: (TB, D) streamed; w: (O, D) lane-dense + grid-resident; b: (1, O).
    # Contract on the last dims so the weight needs no transpose / lane pad.
    y = lax.dot_general(
        x_ref[...], w_ref[...],
        dimension_numbers=(((1,), (1,)), ((), ())),
        preferred_element_type=jnp.float32,
    )
    o_ref[...] = y + b_ref[...]


def logistic_regression_forward(x, w, b, *, target_tile_bytes=4 << 20):
    """x: (B, D) f32, w: (out, D) f32 (PyTorch nn.Linear layout), b: (out,) f32 -> (B, out)."""
    x = jnp.asarray(x, jnp.float32)
    w = jnp.asarray(w, jnp.float32)
    b = jnp.asarray(b, jnp.float32)
    B, D = x.shape
    out_features = w.shape[0]

    # ---- wrapper-side layout plumbing (no compute hoisted into the kernel) ----
    # Lane folding for narrow feature dims: pack k = 128 // D rows per lane row.
    k = 1
    if D < 128 and 128 % D == 0 and B % (128 // D) == 0:
        k = 128 // D
    if k > 1:
        x_k = x.reshape(B // k, k * D)                           # free, row-major
        w_k = jnp.kron(jnp.eye(k, dtype=w.dtype), w)             # (k*out, k*D) block-diag
        b_k = jnp.tile(b, k).reshape(1, k * out_features)
    else:
        x_k = x
        w_k = w                                                  # (out, D) lane-dense
        b_k = b.reshape(1, out_features)

    Bk, Dk = x_k.shape
    Ok = w_k.shape[0]

    TB = _choose_batch_tile(Bk, Dk, target_tile_bytes=target_tile_bytes)
    grid = (pl.cdiv(Bk, TB),)  # ragged tail handled by Pallas (masked writes)

    out = pl.pallas_call(
        _linear_kernel,
        out_shape=jax.ShapeDtypeStruct((Bk, Ok), jnp.float32),
        grid_spec=pltpu.PrefetchScalarGridSpec(
            num_scalar_prefetch=0,
            grid=grid,
            in_specs=[
                # x: streamed + double-buffered along the batch axis.
                pl.BlockSpec((TB, Dk), lambda i: (i, 0)),
                # weight / bias: grid-resident (same block index every step).
                pl.BlockSpec((Ok, Dk), lambda i: (0, 0)),
                pl.BlockSpec((1, Ok), lambda i: (0, 0)),
            ],
            out_specs=pl.BlockSpec((TB, Ok), lambda i: (i, 0)),
        ),
        compiler_params=pltpu.CompilerParams(
            dimension_semantics=("parallel",),   # independent batch tiles
            vmem_limit_bytes=32 << 20,           # explicit; safe on v5e/v6e/v7x
        ),
        cost_estimate=pl.CostEstimate(
            flops=2 * B * D * out_features,
            transcendentals=0,
            bytes_accessed=(B * D + B * out_features + out_features * D) * 4,
        ),
    )(x_k, w_k, b_k)

    # Unfold (B/k, k*out) -> (B, out): free row-major reshape.
    return out.reshape(B, out_features)


if __name__ == "__main__":
    # Deterministic parameter init mimicking nn.Linear defaults
    # (uniform in [-1/sqrt(in_features), 1/sqrt(in_features)]).
    input_dim = 32
    batch = 8

    key = jax.random.PRNGKey(0)
    kx, kw, kb, kx2, kw3, kb3, kx3 = jax.random.split(key, 7)

    bound = 1.0 / jnp.sqrt(jnp.float32(input_dim))
    w = jax.random.uniform(kw, (2, input_dim), jnp.float32, -bound, bound)
    b = jax.random.uniform(kb, (2,), jnp.float32, -bound, bound)
    x = jax.random.normal(kx, (batch, input_dim), jnp.float32)

    # Case 1: small batch, D < 128 -> lane-folded path.
    out = jax.block_until_ready(logistic_regression_forward(x, w, b))
    ref = x @ w.T + b
    assert out.shape == (batch, 2)
    assert jnp.allclose(out, ref, atol=1e-5, rtol=1e-5)

    # Case 2: batch=20 (folded rows = 5, full-extent block).
    x2 = jax.random.normal(kx2, (20, input_dim), jnp.float32)
    out2 = jax.block_until_ready(logistic_regression_forward(x2, w, b))
    ref2 = x2 @ w.T + b
    assert out2.shape == (20, 2)
    assert jnp.allclose(out2, ref2, atol=1e-5, rtol=1e-5)

    # Case 3: D >= 128, no folding; tiny target tile forces a multi-step grid
    # with a ragged tail block (tests Pallas tail masking; no jnp.pad pass).
    d3 = 256
    bound3 = 1.0 / jnp.sqrt(jnp.float32(d3))
    w3 = jax.random.uniform(kw3, (2, d3), jnp.float32, -bound3, bound3)
    b3 = jax.random.uniform(kb3, (2,), jnp.float32, -bound3, bound3)
    x3 = jax.random.normal(kx3, (20, d3), jnp.float32)
    out3 = jax.block_until_ready(
        logistic_regression_forward(x3, w3, b3, target_tile_bytes=8 * d3 * 4)
    )
    ref3 = x3 @ w3.T + b3
    assert out3.shape == (20, 2)
    assert jnp.allclose(out3, ref3, atol=1e-5, rtol=1e-5)

    print("KERNEL_OK")
</pallas_src>

<mosaic_0001>
module attributes {stable_mosaic.version = 11 : i64} {
  func.func @_linear_kernel(%arg0: i32, %arg1: memref<2x128xf32, #tpu.memory_space<vmem>>, %arg2: memref<8x128xf32, #tpu.memory_space<vmem>>, %arg3: memref<1x8xf32, #tpu.memory_space<vmem>>, %arg4: memref<2x8xf32, #tpu.memory_space<vmem>>) attributes {dimension_semantics = [#tpu.dimension_semantics<parallel>], iteration_bounds = array<i64: 1>, scalar_prefetch = 0 : i64, scratch_operands = 0 : i64, tpu.core_type = #tpu.core_type<tc>, window_params = [{transform_indices = @transform_0, window_bounds = array<i64: 2, 128>}, {pipeline_mode = #tpu.pipeline_mode<synchronous>, transform_indices = @transform_1, window_bounds = array<i64: 8, 128>}, {pipeline_mode = #tpu.pipeline_mode<synchronous>, transform_indices = @transform_2, window_bounds = array<i64: 1, 8>}, {transform_indices = @transform_3, window_bounds = array<i64: 2, 8>}]} {
    %c0 = arith.constant 0 : index
    %c0_0 = arith.constant 0 : index
    %0 = vector.load %arg1[%c0, %c0_0] : memref<2x128xf32, #tpu.memory_space<vmem>>, vector<2x128xf32>
    %c0_1 = arith.constant 0 : index
    %c0_2 = arith.constant 0 : index
    %1 = vector.load %arg2[%c0_1, %c0_2] : memref<8x128xf32, #tpu.memory_space<vmem>>, vector<8x128xf32>
    %cst = arith.constant dense<0.000000e+00> : vector<2x8xf32>
    %2 = tpu.matmul %0, %1, %cst {dimension_numbers = #tpu.dot_dimension_numbers<[1], [1], [0], [0], [0, 0, 1, 0], [], []>} : vector<2x128xf32>, vector<8x128xf32>, vector<2x8xf32> -> vector<2x8xf32>
    %c0_3 = arith.constant 0 : index
    %c0_4 = arith.constant 0 : index
    %3 = vector.load %arg3[%c0_3, %c0_4] : memref<1x8xf32, #tpu.memory_space<vmem>>, vector<1x8xf32>
    %4 = vector.broadcast %3 : vector<1x8xf32> to vector<2x8xf32>
    %5 = arith.addf %2, %4 : vector<2x8xf32>
    %c0_5 = arith.constant 0 : index
    %c0_6 = arith.constant 0 : index
    %6 = vector.load %arg4[%c0_5, %c0_6] : memref<2x8xf32, #tpu.memory_space<vmem>>, vector<2x8xf32>
    tpu.vector_store %arg4[%c0_5, %c0_6], %5 {strides = array<i32>} : memref<2x8xf32, #tpu.memory_space<vmem>>, vector<2x8xf32>,
    return
  }
  func.func @transform_0(%arg0: i32) -> (i32, i32) {
    %c0_i32 = arith.constant 0 : i32
    %c0_i32_0 = arith.constant 0 : i32
    return %arg0, %c0_i32 : i32, i32
  }
  func.func @transform_1(%arg0: i32) -> (i32, i32) {
    %c0_i32 = arith.constant 0 : i32
    %c0_i32_0 = arith.constant 0 : i32
    %c0_i32_1 = arith.constant 0 : i32
    return %c0_i32, %c0_i32_0 : i32, i32
  }
  func.func @transform_2(%arg0: i32) -> (i32, i32) {
    %c0_i32 = arith.constant 0 : i32
    %c0_i32_0 = arith.constant 0 : i32
    %c0_i32_1 = arith.constant 0 : i32
    return %c0_i32, %c0_i32_0 : i32, i32
  }
  func.func @transform_3(%arg0: i32) -> (i32, i32) {
    %c0_i32 = arith.constant 0 : i32
    %c0_i32_0 = arith.constant 0 : i32
    return %arg0, %c0_i32 : i32, i32
  }
}

</mosaic_0001>

<bundles_post_ra>
// kernel: tpu_custom_call.1
= control target key start
LH: loop header
LB: loop body
LE: loop exit
PB: predicated region body
PF: predicated region fallthrough
CT: control target
= control target key end

     0   :  { %8 = vsyncpa [#allocation3], 0  ;;  %s206_s0 = inlined_call_operand.hbm [shape: f32[2,128], index: 0, kind: input, shape index: {}]   ;;  %s207_s1 = inlined_call_operand.hbm [shape: f32[8,128], index: 1, kind: input, shape index: {}]   ;;  %s208_s2 = inlined_call_operand.vmem [shape: f32[1,8], index: 2, kind: input, shape index: {}]   ;;  %s209_s3 = inlined_call_operand.hbm [shape: f32[2,8], index: 3, kind: output, shape index: {}]  }
   0x1   :  { %9 = vsyncpa [#allocation6], 0 }
   0x2   :  { %10 = vsyncpa [#allocation4], 0  ;;  %s16_s14 = sshll.u32 %s206_s0, 4  ;;  %s171_s15 = smov [#allocation2]   ;;  %s17_s14 = int_to_ptr.hbm [resolvable:$true] %s16_s14 }
   0x3   :  { %s18_s16 = sshll.u32 %s171_s15, 4  ;;  %s27_s19 = sshll.u32 %s207_s1, 4  ;;  %s19_s16 = int_to_ptr.vmem [resolvable:$true] %s18_s16  ;;  %s28_s19 = int_to_ptr.hbm [resolvable:$true] %s27_s19 }
   0x4   :  { %21 = dma.hbm_to_vmem [thread:$0]  %s17_s14, 32, %s19_s16, [#allocation3]  }
   0x5   :  { %s172_s20 = smov [#allocation5]  }
   0x6   :  { %s29_s21 = sshll.u32 %s172_s20, 4  ;;  %s30_s21 = int_to_ptr.vmem [resolvable:$true] %s29_s21 }
   0x7   :  { %32 = dma.hbm_to_vmem [thread:$0]  %s28_s19, 128, %s30_s21, [#allocation6]  }
   0x8   :  { %165 = dma.done.wait [#allocation3], 32  }
   0x9   :  { %166 = vsyncadd [#allocation3], 4294967264 }
   0xa   :  { %167 = dma.done.wait [#allocation6], 128  }
   0xb   :  { %168 = vsyncadd [#allocation6], 4294967168  ;;  %v44_v0 = vld [vmem:[#allocation5] sm:$0xff]  ;;  %v43_v1 = vld [vmem:[#allocation2] sm:$0x3]  ;;  %s173_s23 = smov [#allocation7]  }
   0xc   :  { %64 = vmatpush.xpose.msra.mxu0 %v44_v0  ;;  %v92_v2 = vld [vmem:[%s208_s2] ss:$0 sm:$0xff]  ;;  %s76_s1 = sshll.u32 %s173_s23, 4  ;;  %s78_s26 = sshll.u32 %s209_s3, 4  ;;  %vm69_vm0 = vcmask 58368   ;;  %s77_s1 = int_to_ptr.vmem [resolvable:$true] %s76_s1  ;;  %s79_s26 = int_to_ptr.hbm [resolvable:$true] %s78_s26 }
   0xf   :  { %65 = vmatmul.f32.vlgmr.msra.gmra.mxu0 %v43_v1 }
  0x8c   :  { %v66_v3 = vpop.f32.mrf.mxu0 }
  0x8d   :  { %v67_v4 = vadd.f32 %v92_v2, %v66_v3 }
  0x8f   :  { %70 = vst.msk [vmem:[#allocation7] sm:$0x3] %vm69_vm0, %v67_v4 }
  0x90   :  { %81 = dma.vmem_to_hbm [thread:$0]  %s77_s1, 32, %s79_s26, [#allocation4]  }
  0x91   :  { %169 = dma.done.wait [#allocation4], 32  }
  0x92   :  { %170 = vsyncadd [#allocation4], 4294967264 }
  0x93   :  { %86 = vsyncpa [#allocation3], 1 }
  0x94   :  { %87 = vsyncpa [#allocation6], 1 }
  0x95   :  { %88 = vsyncpa [#allocation4], 1 }

</bundles_post_ra>
